<compile_context>
chip_gen: v5e
topology: v5e:2x2
jax: 0.10.0
libtpu: 0.0.40
codegen_flags: <defaults>
</compile_context>

<pallas_src>
import functools

import jax
import jax.numpy as jnp
import numpy as np
from jax.experimental import pallas as pl
from jax.experimental.pallas import tpu as pltpu

LANE = 128  # TPU lane width; feature dims are zero-padded to this


# ------------------------------ helpers --------------------------------------
def _pad2d(t, rows, cols):
    """Zero-pad a 2-D array up to (rows, cols)."""
    return jnp.pad(t, ((0, rows - t.shape[0]), (0, cols - t.shape[1])))


def _mosaic_params(block_bytes, dims):
    """CompilerParams with a VMEM limit sized to the double-buffered footprint."""
    limit = int(min(max(2 * block_bytes + (4 << 20), 16 << 20), 48 << 20))
    if dims is None:
        return pltpu.CompilerParams(vmem_limit_bytes=limit)
    return pltpu.CompilerParams(dimension_semantics=dims, vmem_limit_bytes=limit)


# ------------------------------ kernels ---------------------------------------
def _gcn_conv_kernel(a_ref, h_ref, w_ref, b_ref, o_ref, *, relu):
    # a_ref: (TM, N) bf16 strip of the normalized adjacency
    # h_ref: (N, F)  bf16 previous-layer activations (full, resident)
    # w_ref: (F, H)  bf16 weights; b_ref: (1, H) f32 bias; o_ref: (TM, H) bf16
    agg = jnp.dot(a_ref[...], h_ref[...], preferred_element_type=jnp.float32)
    h = jnp.dot(agg.astype(jnp.bfloat16), w_ref[...],
                preferred_element_type=jnp.float32) + b_ref[...]
    if relu:
        h = jnp.maximum(h, 0.0)
    o_ref[...] = h.astype(o_ref.dtype)


def _pool_linear_kernel(p_ref, h_ref, wl_ref, bl_ref, o_ref):
    # p_ref: (G, N) f32 mean-pool matrix; h_ref: (N, H) bf16 conv3 output
    # wl_ref: (H, C) bf16; bl_ref: (1, C) f32; o_ref: (G, C) f32
    pooled = jnp.dot(p_ref[...], h_ref[...].astype(jnp.float32),
                     preferred_element_type=jnp.float32)
    # TODO(synk): F.dropout(p=0.5) is identity in eval mode (training=False).
    o_ref[...] = jnp.dot(pooled, wl_ref[...].astype(jnp.float32),
                         preferred_element_type=jnp.float32) + bl_ref[...]


# ------------------------------ wrappers ---------------------------------------
def _gcn_conv(a_bf, h_prev, w, b, *, relu, tm):
    n = a_bf.shape[0]
    f = h_prev.shape[1]
    h_out = w.shape[1]
    blk_bytes = (tm * n + n * f + f * h_out + tm * h_out) * 2 + h_out * 4
    return pl.pallas_call(
        functools.partial(_gcn_conv_kernel, relu=relu),
        out_shape=jax.ShapeDtypeStruct((n, h_out), jnp.bfloat16),
        grid_spec=pltpu.PrefetchScalarGridSpec(
            num_scalar_prefetch=0,
            grid=(n // tm,),
            in_specs=[
                pl.BlockSpec((tm, n), lambda i: (i, 0)),      # adjacency row strip
                pl.BlockSpec((n, f), lambda i: (0, 0)),       # full activations
                pl.BlockSpec((f, h_out), lambda i: (0, 0)),   # weights (bf16)
                pl.BlockSpec((1, h_out), lambda i: (0, 0)),   # bias (f32)
            ],
            out_specs=pl.BlockSpec((tm, h_out), lambda i: (i, 0)),
        ),
        compiler_params=_mosaic_params(blk_bytes, ("parallel",)),
    )(a_bf, h_prev, w, b)


def _pool_linear(p, h3, wl, bl):
    g, n = p.shape
    f = h3.shape[1]
    c = wl.shape[1]
    vmem = pl.BlockSpec(memory_space=pltpu.MemorySpace.VMEM)
    blk_bytes = g * n * 4 + n * f * 2 + f * c * 2 + c * 4 + g * c * 4
    return pl.pallas_call(
        _pool_linear_kernel,
        out_shape=jax.ShapeDtypeStruct((g, c), jnp.float32),
        in_specs=[vmem] * 4,
        out_specs=vmem,
        compiler_params=_mosaic_params(blk_bytes, None),
    )(p, h3, wl, bl)


def gcn_forward(a_norm, p, x, params, *, tm=128):
    """Full forward. a_norm = D^-1/2 (A+I) D^-1/2, p = mean-pool matrix."""
    (w1, b1, w2, b2, w3, b3, wl, bl) = params
    n = a_norm.shape[0]
    c = wl.shape[1]
    tm = min(tm, n)
    assert n % tm == 0 and tm % 8 == 0, "node count must tile into 8-aligned row blocks"

    def padw(w_):   # (in, out) -> (128, 128) bf16
        return _pad2d(w_.astype(jnp.float32), LANE, LANE).astype(jnp.bfloat16)

    def padb(b_):   # (1, out) -> (1, 128) f32
        return _pad2d(b_.astype(jnp.float32), 1, LANE)

    a_bf = a_norm.astype(jnp.bfloat16)
    h = _pad2d(x.astype(jnp.float32), n, LANE).astype(jnp.bfloat16)

    h = _gcn_conv(a_bf, h, padw(w1), padb(b1), relu=True, tm=tm)   # conv1 + relu
    h = _gcn_conv(a_bf, h, padw(w2), padb(b2), relu=True, tm=tm)   # conv2 + relu
    h = _gcn_conv(a_bf, h, padw(w3), padb(b3), relu=False, tm=tm)  # conv3

    out_pad = _pool_linear(p.astype(jnp.float32), h, padw(wl), padb(bl))
    return out_pad[:, :c]


# ------------------------------ reference --------------------------------------
def gcn_reference(a_norm, p, x, params):
    """Numpy f32 reference mirroring the kernel's bf16-operand / f32-acc numerics."""
    def rt(t):  # bf16 round-trip (matches host-side casts + in-kernel agg cast)
        return np.asarray(jnp.asarray(t, jnp.float32).astype(jnp.bfloat16)
                          .astype(jnp.float32))
    (w1, b1, w2, b2, w3, b3, wl, bl) = params
    a = rt(a_norm)
    h = rt(x)
    for w, b, act in ((w1, b1, True), (w2, b2, True), (w3, b3, False)):
        agg = rt(a @ h)
        h = agg @ rt(w) + np.asarray(b, np.float32)
        if act:
            h = np.maximum(h, 0.0)
        h = rt(h)   # conv outputs travel between pallas_calls as bf16
    pooled = np.asarray(p, np.float32) @ h
    return pooled @ rt(wl) + np.asarray(bl, np.float32)


# --------------------------------- main -----------------------------------------
if __name__ == "__main__":
    # Small problem consistent with the module: num_node_features=8,
    # hidden_channels=32, num_classes=4; a batch of G=4 disjoint graphs.
    N, F_IN, H, C, G, E = 256, 8, 32, 4, 4, 1024
    NPG = N // G                      # nodes per graph

    key = jax.random.PRNGKey(0)
    ks = jax.random.split(key, 12)

    x = jax.random.normal(ks[0], (N, F_IN), jnp.float32)

    # random intra-graph edges (no self-loops; duplicates allowed -> counted)
    src_l = jax.random.randint(ks[1], (E,), 0, NPG)
    off = jax.random.randint(ks[2], (E,), 1, NPG)
    gid = jax.random.randint(ks[3], (E,), 0, G)
    src = src_l + gid * NPG
    dst = (src_l + off) % NPG + gid * NPG

    a = jnp.zeros((N, N), jnp.float32).at[dst, src].add(1.0)   # A[i,j] = #edges j->i
    a_hat = a + jnp.eye(N, dtype=jnp.float32)                  # add self-loops
    deg = a_hat.sum(axis=1)
    dinv = 1.0 / jnp.sqrt(deg)
    a_norm = dinv[:, None] * a_hat * dinv[None, :]             # GCN normalization

    batch = jnp.arange(N) // NPG
    onehot = (batch[None, :] == jnp.arange(G)[:, None]).astype(jnp.float32)
    p = onehot / onehot.sum(axis=1, keepdims=True)             # mean-pool matrix

    def glorot(k, shape):
        lim = float(np.sqrt(6.0 / (shape[0] + shape[1])))
        return jax.random.uniform(k, shape, jnp.float32, -lim, lim)

    # deterministic init (torch.manual_seed(1234) is not reproducible in JAX)
    w1 = glorot(ks[4], (F_IN, H)); b1 = 0.01 * jax.random.normal(ks[5], (1, H), jnp.float32)
    w2 = glorot(ks[6], (H, H));    b2 = 0.01 * jax.random.normal(ks[7], (1, H), jnp.float32)
    w3 = glorot(ks[8], (H, H));    b3 = 0.01 * jax.random.normal(ks[9], (1, H), jnp.float32)
    wl = glorot(ks[10], (H, C));   bl = 0.01 * jax.random.normal(ks[11], (1, C), jnp.float32)
    params = (w1, b1, w2, b2, w3, b3, wl, bl)

    out = jax.block_until_ready(gcn_forward(a_norm, p, x, params))

    ref = gcn_reference(a_norm, p, x, params)
    np.testing.assert_allclose(np.asarray(out), ref, rtol=5e-3, atol=5e-3)

    print("KERNEL_OK")
</pallas_src>

<mosaic_0001>
module attributes {stable_mosaic.version = 11 : i64} {
  func.func @_gcn_conv_kernel(%arg0: i32, %arg1: memref<128x256xbf16, #tpu.memory_space<vmem>>, %arg2: memref<256x128xbf16, #tpu.memory_space<vmem>>, %arg3: memref<128x128xbf16, #tpu.memory_space<vmem>>, %arg4: memref<1x128xf32, #tpu.memory_space<vmem>>, %arg5: memref<128x128xbf16, #tpu.memory_space<vmem>>) attributes {dimension_semantics = [#tpu.dimension_semantics<parallel>], iteration_bounds = array<i64: 2>, scalar_prefetch = 0 : i64, scratch_operands = 0 : i64, tpu.core_type = #tpu.core_type<tc>, window_params = [{transform_indices = @transform_0, window_bounds = array<i64: 128, 256>}, {pipeline_mode = #tpu.pipeline_mode<synchronous>, transform_indices = @transform_1, window_bounds = array<i64: 256, 128>}, {pipeline_mode = #tpu.pipeline_mode<synchronous>, transform_indices = @transform_2, window_bounds = array<i64: 128, 128>}, {pipeline_mode = #tpu.pipeline_mode<synchronous>, transform_indices = @transform_3, window_bounds = array<i64: 1, 128>}, {transform_indices = @transform_4, window_bounds = array<i64: 128, 128>}]} {
    %c0 = arith.constant 0 : index
    %c0_0 = arith.constant 0 : index
    %0 = vector.load %arg1[%c0, %c0_0] : memref<128x256xbf16, #tpu.memory_space<vmem>>, vector<128x256xbf16>
    %c0_1 = arith.constant 0 : index
    %c0_2 = arith.constant 0 : index
    %1 = vector.load %arg2[%c0_1, %c0_2] : memref<256x128xbf16, #tpu.memory_space<vmem>>, vector<256x128xbf16>
    %cst = arith.constant dense<0.000000e+00> : vector<128x128xf32>
    %2 = tpu.matmul %0, %1, %cst {dimension_numbers = #tpu.dot_dimension_numbers<[1], [0], [0], [1], [0, 0, 1, 1], [], []>} : vector<128x256xbf16>, vector<256x128xbf16>, vector<128x128xf32> -> vector<128x128xf32>
    %3 = arith.truncf %2 : vector<128x128xf32> to vector<128x128xbf16>
    %c0_3 = arith.constant 0 : index
    %c0_4 = arith.constant 0 : index
    %4 = vector.load %arg3[%c0_3, %c0_4] : memref<128x128xbf16, #tpu.memory_space<vmem>>, vector<128x128xbf16>
    %cst_5 = arith.constant dense<0.000000e+00> : vector<128x128xf32>
    %5 = tpu.matmul %3, %4, %cst_5 {dimension_numbers = #tpu.dot_dimension_numbers<[1], [0], [0], [1], [0, 0, 1, 1], [], []>} : vector<128x128xbf16>, vector<128x128xbf16>, vector<128x128xf32> -> vector<128x128xf32>
    %c0_6 = arith.constant 0 : index
    %c0_7 = arith.constant 0 : index
    %6 = vector.load %arg4[%c0_6, %c0_7] : memref<1x128xf32, #tpu.memory_space<vmem>>, vector<1x128xf32>
    %7 = vector.broadcast %6 : vector<1x128xf32> to vector<128x128xf32>
    %8 = arith.addf %5, %7 : vector<128x128xf32>
    %cst_8 = arith.constant 0.000000e+00 : f32
    %9 = vector.broadcast %cst_8 : f32 to vector<128x128xf32>
    %10 = arith.maximumf %8, %9 : vector<128x128xf32>
    %11 = arith.truncf %10 : vector<128x128xf32> to vector<128x128xbf16>
    %c0_9 = arith.constant 0 : index
    %c0_10 = arith.constant 0 : index
    %12 = vector.load %arg5[%c0_9, %c0_10] : memref<128x128xbf16, #tpu.memory_space<vmem>>, vector<128x128xbf16>
    tpu.vector_store %arg5[%c0_9, %c0_10], %11 {strides = array<i32>} : memref<128x128xbf16, #tpu.memory_space<vmem>>, vector<128x128xbf16>,
    return
  }
  func.func @transform_0(%arg0: i32) -> (i32, i32) {
    %c0_i32 = arith.constant 0 : i32
    %c0_i32_0 = arith.constant 0 : i32
    return %arg0, %c0_i32 : i32, i32
  }
  func.func @transform_1(%arg0: i32) -> (i32, i32) {
    %c0_i32 = arith.constant 0 : i32
    %c0_i32_0 = arith.constant 0 : i32
    %c0_i32_1 = arith.constant 0 : i32
    return %c0_i32, %c0_i32_0 : i32, i32
  }
  func.func @transform_2(%arg0: i32) -> (i32, i32) {
    %c0_i32 = arith.constant 0 : i32
    %c0_i32_0 = arith.constant 0 : i32
    %c0_i32_1 = arith.constant 0 : i32
    return %c0_i32, %c0_i32_0 : i32, i32
  }
  func.func @transform_3(%arg0: i32) -> (i32, i32) {
    %c0_i32 = arith.constant 0 : i32
    %c0_i32_0 = arith.constant 0 : i32
    %c0_i32_1 = arith.constant 0 : i32
    return %c0_i32, %c0_i32_0 : i32, i32
  }
  func.func @transform_4(%arg0: i32) -> (i32, i32) {
    %c0_i32 = arith.constant 0 : i32
    %c0_i32_0 = arith.constant 0 : i32
    return %arg0, %c0_i32 : i32, i32
  }
}

</mosaic_0001>

<bundles_post_ra>
// kernel: tpu_custom_call.1
= control target key start
LH: loop header
LB: loop body
LE: loop exit
PB: predicated region body
PF: predicated region fallthrough
CT: control target
= control target key end

     0   :  { %9 = vsyncpa [#allocation3], 0  ;;  %s1627_s0 = inlined_call_operand.hbm [shape: bf16[256,256], index: 0, kind: input, shape index: {}]   ;;  %s1628_s1 = inlined_call_operand.hbm [shape: bf16[256,128], index: 1, kind: input, shape index: {}]   ;;  %s1629_s2 = inlined_call_operand.hbm [shape: bf16[128,128], index: 2, kind: input, shape index: {}]   ;;  %s1630_s3 = inlined_call_operand.vmem [shape: f32[1,128], index: 3, kind: input, shape index: {}]   ;;  %s1631_s4 = inlined_call_operand.hbm [shape: bf16[256,128], index: 4, kind: output, shape index: {}]  }
   0x1   :  { %11 = vsyncpa [#allocation3 + $0x1], 0 }
   0x2   :  { %12 = vsyncpa [#allocation6], 0 }
   0x3   :  { %13 = vsyncpa [#allocation4], 0 }
   0x4   :  { %15 = vsyncpa [#allocation4 + $0x1], 0  ;;  %s1419_s15 = smov 0   ;;  %s1421_s16 = smov 0  }
   0x5   :  { %s1423_s17 = smov 0   ;;  %s1425_s18 = smov 0  }
   0x6 LB: > { %s1440_s19 = sadd.s32 4294967295, %s1384_s18   ;;  %s857_s20 = sadd.s32 4294967294, %s1384_s18   ;;  %s1384_s18 = sphi %s1425_s18, %s1641_s18   ;;  %s1380_s17 = sphi %s1423_s17, %s1640_s17   ;;  %s1376_s16 = sphi %s1421_s16, %s1639_s16   ;;  %s1372_s15 = sphi %s1419_s15, %s1638_s15  }
   0x7   : > { %p41_p0 = scmp.ne.s32.totalorder %s1376_s16, %s1372_s15  ;;  %p42_p1 = scmp.eq.s32.totalorder %s1440_s19, 0 }
   0x8   : > { %p128_p2 = scmp.eq.s32.totalorder %s1440_s19, 1  ;;  %p134_p3 = scmp.eq.s32.totalorder %s857_s20, 1 }
   0x9   : > { %p1449_p4 = por %p42_p1, %p41_p0  ;;  %p858_p5 = scmp.ge.s32.totalorder %s1384_s18, 1 }
   0xa   : > { %p1454_p6 = por %p134_p3, %p41_p0  ;;  %p141_p7 = scmp.lt.s32.totalorder %s1384_s18, 3 }
   0xb   : > { %s152_s25 = sshll.u32 %s1628_s1, 4  ;;  %s1386_s27 = smov [#allocation5]   ;;  %s153_s25 = int_to_ptr.hbm [resolvable:$true] %s152_s25 }
   0xc   : > { %p1462_p8 = pnand %p858_p5, %p141_p7  ;;  %s154_s28 = sshll.u32 %s1386_s27, 4  ;;  %s155_s28 = int_to_ptr.vmem [resolvable:$true] %s154_s28 }
   0xd   : > { %s166_s5 = sshll.u32 %s1629_s2, 4  ;;  %s1387_s6 = smov 64   ;;  %s167_s5 = int_to_ptr.hbm [resolvable:$true] %s166_s5 }
   0xe   : > { %p1162_p9 = pneg %p1462_p8  ;;  %s1388_s7 = smov 4  }
   0xf   : > { %s1389_s8 = smov [#allocation7]   ;;  %s1475_s10 = sadd.s32 1, %s1384_s18  }
  0x10   : > { %p1163_p10 = pnand %p1162_p9, %p42_p1  ;;  %s168_s9 = sshll.u32 %s1389_s8, 4  ;;  %s169_s9 = int_to_ptr.vmem [resolvable:$true] %s168_s9 }
  0x11   : > { %s28_s11 = sadd.s32 1, %s1380_s17  ;;  %s25_s12 = ssub.s32 %s1384_s18, %s1475_s10 }
  0x12   : > { %1165 = dma.hbm_to_vmem [thread:$0]  (!%p1163_p10), %s153_s25, 2048, %s155_s28, [#allocation6], %s1387_s6, %s1387_s6, %s1388_s7  }
  0x13   : > { %1168 = dma.hbm_to_vmem [thread:$0]  (!%p1163_p10), %s167_s5, 1024, %s169_s9, [#allocation6], %s1387_s6, %s1387_s6, %s1388_s7  }
  0x14   : > { %p35_p12 = scmp.ne.s32.totalorder %s1380_s17, %s1376_s16  ;;  %p26_p13 = scmp.eq.s32.totalorder %s25_s12, 0 }
  0x15   : > { %p36_p0 = scmp.eq.s32.totalorder %s1384_s18, 0  ;;  %p1179_p5 = scmp.lt.s32.totalorder %s1384_s18, 2 }
  0x16   : > { %p1485_p3 = por %p128_p2, %p35_p12  ;;  %s185_s20 = sand.u32 1, %s1380_s17  }
  0x17   : > { %s1491_s14 = scalar_select %p26_p13, %s1380_s17, %s28_s11  }
  0x18   : > { %p37_p7 = por %p36_p0, %p35_p12  ;;  %s862_s23 = sshll.u32 %s185_s20, 7 }
  0x19   : > { %s1037_s24 = sshll.u32 %s1384_s18, 7  ;;  %s189_s29 = scalar_lea.vmem [#allocation2], %s862_s23 }
  0x1a   : > { %s195_s28 = scalar_lea.hbm %s1627_s0, %s1037_s24  ;;  %s198_s30 = sshll.u32 %s189_s29, 4  ;;  %s199_s30 = int_to_ptr.vmem [resolvable:$true] %s198_s30 }
  0x1b   : > { %s196_s5 = sshll.u32 %s195_s28, 4  ;;  %p1498_p2 = pnand %p1179_p5, %p37_p7  ;;  %s197_s5 = int_to_ptr.hbm [resolvable:$true] %s196_s5 }
  0x1c   : > { %s186_s7 = scalar_lea.sflag [#allocation3], %s185_s20  ;;  %s1284_s8 = sshra.s32 %s197_s5, 4  ;;  %s1285_s8 = int_to_ptr.hbm [resolvable:$true] %s1284_s8 }
  0x1d   : > { %s1286_s9 = scalar_lea.hbm %s1285_s8, 128  ;;  %p1288_p10 = pneg %p1498_p2 }
  0x1e   : > { %p1287_p9 = scmp.ne.s32.totalorder %s1285_s8, %s1286_s9  ;;  %s1291_s23 = scalar_lea.hbm %s1627_s0, 256 }
  0x1f   : > { %p1292_p0 = scmp.lt.s32.totalorder %s1285_s8, %s1627_s0  ;;  %p1293_p5 = scmp.lt.s32.totalorder %s1291_s23, %s1286_s9 }
  0x20   : > { %p1289_p12 = pnand %p1288_p10, %p1287_p9 }
  0x21   : > { %p1294_p7 = por %p1293_p5, %p1292_p0 }
  0x22   : > { %p1290_p13 = pneg %p1289_p12 }
  0x24   : > { %p1295_p11 = pnand %p1294_p7, %p1290_p13 }
  0x26   : > { %1298 = shalt.err (!%p1295_p11)
}
  0x27   : > { %s1390_s20 = smov 128   ;;  %s1391_s27 = smov 8  }
  0x28   : > { %1172 = dma.hbm_to_vmem [thread:$0]  (!%p1498_p2), %s197_s5, 2048, %s199_s30, %s186_s7, %s1390_s20, %s1390_s20, %s1391_s27  }
  0x29   : > { %210 = sbr.rel (%p1462_p8) target bundleno = 450 (0x1c2), region = 36  ;;  %s1515_s28 = sand.u32 (!%p1462_p8), 1, %s1376_s16  }
  0x2a   : > { %s867_s29 = sshll.u32 (!%p1462_p8), %s1515_s28, 7  ;;  %s213_s8 = scalar_lea.sflag (!%p1462_p8), [#allocation3], %s1515_s28 }
  0x2b   : > { %s1519_s9 = scalar_lea.vmem (!%p1462_p8), [#allocation2], %s867_s29 }
  0x2e   : > { %1359 = dma.done.wait (%p1449_p4), %s213_s8, 2048  }
  0x2f   : > { %1361 = vsyncadd (%p1449_p4), %s213_s8, 4294965248 }
  0x30   : > { %1363 = dma.done.wait (%p42_p1), [#allocation6], 3072  }
  0x31   : > { %1365 = vsyncadd (%p42_p1), [#allocation6], 4294964224  ;;  %v1061_v0 = vld [vmem:[#allocation5 + $0x38] sm:$0xff]  ;;  %v1060_v2 = vld [vmem:[#allocation5 + $0x30] sm:$0xff]  ;;  %s870_s30 = sshll.u32 %s1515_s28, 6  ;;  %s1078_s6 = sshll.u32 %s1440_s19, 6 }
  0x32   : > { %v1069_v1 = vld [vmem:[#allocation5 + $0x78] sm:$0xff]  ;;  %478 = vmatpush.bf16.msra.mxu0 %v1061_v0  ;;  %1126 = vmatpush.bf16.msra.mxu3 %v1061_v0  ;;  %v1068_v3 = vld [vmem:[#allocation5 + $0x70] sm:$0xff]  ;;  %v1059_v4 = vld [vmem:[#allocation5 + $0x28] sm:$0xff]  ;;  %s1569_s5 = scalar_lea.vmem [#allocation8], %s870_s30  ;;  %s761_s12 = scalar_lea.hbm %s1631_s4, %s1078_s6 }
  0x33   : > { %527 = vmatpush.bf16.msra.mxu1 %v1069_v1  ;;  %v1067_v5 = vld [vmem:[#allocation5 + $0x68] sm:$0xff]  ;;  %v1058_v6 = vld [vmem:[#allocation5 + $0x20] sm:$0xff]  ;;  %v1057_v8 = vld [vmem:[#allocation5 + $0x18] sm:$0xff]  ;;  %s762_s23 = sshll.u32 %s1569_s5, 4  ;;  %s764_s24 = sshll.u32 %s761_s12, 4  ;;  %s763_s23 = int_to_ptr.vmem [resolvable:$true] %s762_s23  ;;  %s765_s24 = int_to_ptr.hbm [resolvable:$true] %s764_s24 }
  0x34   : > { %v1066_v7 = vld [vmem:[#allocation5 + $0x60] sm:$0xff]  ;;  %v1065_v9 = vld [vmem:[#allocation5 + $0x58] sm:$0xff]  ;;  %v1056_v10 = vld [vmem:[#allocation5 + $0x10] sm:$0xff]  ;;  %s750_s25 = scalar_lea.sflag [#allocation4], %s1515_s28  ;;  %s1328_s19 = sshra.s32 %s765_s24, 4  ;;  %s1329_s19 = int_to_ptr.hbm [resolvable:$true] %s1328_s19 }
  0x35   : > { %v1064_v11 = vld [vmem:[#allocation5 + $0x50] sm:$0xff]  ;;  %v1055_v12 = vld [vmem:[#allocation5 + $0x8] sm:$0xff]  ;;  %v1054_v14 = vld [vmem:[#allocation5] sm:$0xff]  ;;  %s1330_s20 = scalar_lea.hbm %s1329_s19, 64  ;;  %s1334_s8 = scalar_lea.hbm %s1631_s4, 128 }
  0x36   : > { %479 = vmatpush.bf16.msra.mxu0 %v1060_v2  ;;  %1127 = vmatpush.bf16.msra.mxu3 %v1060_v2  ;;  %v1063_v13 = vld [vmem:[#allocation5 + $0x48] sm:$0xff]  ;;  %v873_v15 = vld [vmem:[%s1519_s9] sm:$0xf]  ;;  %v1038_v20 = vld [vmem:[%s1519_s9 + $0x4] sm:$0xf]  ;;  %p1331_p1 = scmp.ne.s32.totalorder %s1329_s19, %s1330_s20  ;;  %p1335_p11 = scmp.lt.s32.totalorder %s1329_s19, %s1631_s4 }
  0x37   : > { %528 = vmatpush.bf16.msra.mxu1 %v1068_v3  ;;  %v1039_v16 = vld [vmem:[%s1519_s9 + $0x4] sm:$0xf0]  ;;  %v921_v17 = vld [vmem:[%s1519_s9 + $0x60] sm:$0xf]  ;;  %v875_v21 = vld [vmem:[%s1519_s9 + $0x8] sm:$0xf0]  ;;  %p1336_p2 = scmp.lt.s32.totalorder %s1334_s8, %s1330_s20 }
  0x38   : > { %v1051_v18 = vld [vmem:[%s1519_s9 + $0x64] sm:$0xf0]  ;;  %v1062_v19 = vld [vmem:[#allocation5 + $0x40] sm:$0xff]  ;;  %v874_v22 = vor.u32 %v1039_v16, %v873_v15  ;;  %v878_v24 = vor.u32 %v1038_v20, %v875_v21  ;;  %v881_v25 = vld [vmem:[%s1519_s9 + $0x10] sm:$0xf]  ;;  %p1332_p4 = pnand %p1331_p1, %p1485_p3 }
  0x39   : > { %v922_v23 = vor.u32 %v1051_v18, %v921_v17  ;;  %v1041_v26 = vld [vmem:[%s1519_s9 + $0x14] sm:$0xf0]  ;;  %v929_v27 = vld [vmem:[%s1519_s9 + $0x70] sm:$0xf]  ;;  %v1040_v29 = vld [vmem:[%s1519_s9 + $0x14] sm:$0xf]  ;;  %p1337_p9 = por %p1336_p2, %p1335_p11 }
  0x3a   : > { %480 = vmatpush.bf16.msra.mxu0 %v1059_v4  ;;  %1128 = vmatpush.bf16.msra.mxu3 %v1059_v4  ;;  %v1053_v28 = vld [vmem:[%s1519_s9 + $0x74] sm:$0xf0]  ;;  %v883_v30 = vld [vmem:[%s1519_s9 + $0x18] sm:$0xf0]  ;;  %v882_v31 = vor.u32 %v1041_v26, %v881_v25  ;;  %v889_v34 = vld [vmem:[%s1519_s9 + $0x20] sm:$0xf]  ;;  %p1333_p8 = pneg %p1332_p4 }
  0x3b   : > { %529 = vmatpush.bf16.msra.mxu1 %v1067_v5  ;;  %v930_v32 = vor.u32 %v1053_v28, %v929_v27  ;;  %v886_v33 = vor.u32 %v1040_v29, %v883_v30  ;;  %v1043_v35 = vld [vmem:[%s1519_s9 + $0x24] sm:$0xf0]  ;;  %v1050_v36 = vld [vmem:[%s1519_s9 + $0x64] sm:$0xf]  ;;  %v923_v37 = vld [vmem:[%s1519_s9 + $0x68] sm:$0xf0] }
  0x3c   : > { %v1042_v38 = vld [vmem:[%s1519_s9 + $0x24] sm:$0xf]  ;;  %v891_v39 = vld [vmem:[%s1519_s9 + $0x28] sm:$0xf0]  ;;  %v890_v40 = vor.u32 %v1043_v35, %v889_v34  ;;  %v926_v41 = vor.u32 %v1050_v36, %v923_v37  ;;  %v897_v43 = vld [vmem:[%s1519_s9 + $0x30] sm:$0xf]  ;;  %p1338_p10 = pnand %p1337_p9, %p1333_p8 }
  0x3d   : > { %v894_v42 = vor.u32 %v1042_v38, %v891_v39  ;;  %v1045_v44 = vld [vmem:[%s1519_s9 + $0x34] sm:$0xf0]  ;;  %v1052_v45 = vld [vmem:[%s1519_s9 + $0x74] sm:$0xf]  ;;  %v931_v46 = vld [vmem:[%s1519_s9 + $0x78] sm:$0xf0] }
  0x3e   : > { %481 = vmatpush.bf16.msra.mxu0 %v1058_v6  ;;  %1129 = vmatpush.bf16.msra.mxu3 %v1058_v6  ;;  %v1044_v47 = vld [vmem:[%s1519_s9 + $0x34] sm:$0xf]  ;;  %v899_v48 = vld [vmem:[%s1519_s9 + $0x38] sm:$0xf0]  ;;  %v898_v49 = vor.u32 %v1045_v44, %v897_v43  ;;  %v934_v50 = vor.u32 %v1052_v45, %v931_v46  ;;  %v1075_v54 = vld [vmem:[#allocation7 + $0x28] sm:$0xff] }
  0x3f   : > { %530 = vmatpush.bf16.msra.mxu1 %v1066_v7  ;;  %v902_v51 = vor.u32 %v1044_v47, %v899_v48  ;;  %v1077_v52 = vld [vmem:[#allocation7 + $0x38] sm:$0xff]  ;;  %v1076_v53 = vld [vmem:[#allocation7 + $0x30] sm:$0xff]  ;;  %v905_v55 = vld [vmem:[%s1519_s9 + $0x40] sm:$0xf] }
  0x40   : > { %652 = vmatpush.bf16.msra.mxu2 %v1077_v52  ;;  %v1047_v56 = vld [vmem:[%s1519_s9 + $0x44] sm:$0xf0]  ;;  %v1046_v57 = vld [vmem:[%s1519_s9 + $0x44] sm:$0xf]  ;;  %v907_v58 = vld [vmem:[%s1519_s9 + $0x48] sm:$0xf0] }
  0x41   : > { %v1074_v59 = vld [vmem:[#allocation7 + $0x20] sm:$0xff]  ;;  %v906_v60 = vor.u32 %v1047_v56, %v905_v55  ;;  %v910_v61 = vor.u32 %v1046_v57, %v907_v58  ;;  %v1073_v62 = vld [vmem:[#allocation7 + $0x18] sm:$0xff]  ;;  %v913_v63 = vld [vmem:[%s1519_s9 + $0x50] sm:$0xf] }
  0x42   : > { %482 = vmatpush.bf16.msra.mxu0 %v1057_v8  ;;  %1130 = vmatpush.bf16.msra.mxu3 %v1057_v8  ;;  %v1049_v0 = vld [vmem:[%s1519_s9 + $0x54] sm:$0xf0]  ;;  %v915_v2 = vld [vmem:[%s1519_s9 + $0x58] sm:$0xf0]  ;;  %v1071_v6 = vld [vmem:[#allocation7 + $0x8] sm:$0xff] }
  0x43   : > { %531 = vmatpush.bf16.msra.mxu1 %v1065_v9 }
  0x44   : > { %653 = vmatpush.bf16.msra.mxu2 %v1076_v53 }
  0x46   : > { %483 = vmatpush.bf16.msra.mxu0 %v1056_v10  ;;  %1131 = vmatpush.bf16.msra.mxu3 %v1056_v10 }
  0x47   : > { %532 = vmatpush.bf16.msra.mxu1 %v1064_v11 }
  0x48   : > { %654 = vmatpush.bf16.msra.mxu2 %v1075_v54 }
  0x4a   : > { %484 = vmatpush.bf16.msra.mxu0 %v1055_v12  ;;  %1132 = vmatpush.bf16.msra.mxu3 %v1055_v12 }
  0x4b   : > { %533 = vmatpush.bf16.msra.mxu1 %v1063_v13 }
  0x4c   : > { %655 = vmatpush.bf16.msra.mxu2 %v1074_v59 }
  0x4e   : > { %485 = vmatpush.bf16.msra.mxu0 %v1054_v14  ;;  %1133 = vmatpush.bf16.msra.mxu3 %v1054_v14 }
  0x4f   : > { %534 = vmatpush.bf16.msra.mxu1 %v1062_v19 }
  0x50   : > { %656 = vmatpush.bf16.msra.mxu2 %v1073_v62 }
  0x51   : > { %486 = vmatmul.bf16.vlgmr.msra.gmra.mxu0 %v874_v22  ;;  %516 = vmatmul.bf16.vlgmr.msra.gmra.mxu3 %v922_v23 }
  0x52   : > { %1134 = vmatpush.bf16.msrb.mxu3 %v1069_v1  ;;  %535 = vmatmul.bf16.vlgmr.msra.gmra.mxu1 %v878_v24  ;;  %v1048_v1 = vld [vmem:[%s1519_s9 + $0x54] sm:$0xf] }
  0x53   : > { %v918_v4 = vor.u32 %v1048_v1, %v915_v2  ;;  %v1564_v1 = vld [vmem:[%s1630_s3] ss:$0 sm:$0xff] }
  0x56   : > { %1135 = vmatpush.bf16.msrb.mxu3 %v1068_v3  ;;  %v914_v3 = vor.u32 %v1049_v0, %v913_v63 }
  0x5a   : > { %1136 = vmatpush.bf16.msrb.mxu3 %v1067_v5  ;;  %v1072_v5 = vld [vmem:[#allocation7 + $0x10] sm:$0xff] }
  0x5b   : > { %657 = vmatpush.bf16.msra.mxu2 %v1072_v5 }
  0x5e   : > { %1137 = vmatpush.bf16.msrb.mxu3 %v1066_v7  ;;  %v1070_v7 = vld [vmem:[#allocation7] sm:$0xff] }
  0x5f   : > { %658 = vmatpush.bf16.msra.mxu2 %v1071_v6 }
  0x61   : > { %491 = vmatmul.bf16.gmra.mxu0 %v882_v31  ;;  %521 = vmatmul.bf16.gmra.mxu3 %v930_v32 }
  0x62   : > { %1138 = vmatpush.bf16.msrb.mxu3 %v1065_v9  ;;  %540 = vmatmul.bf16.gmra.mxu1 %v886_v33 }
  0x63   : > { %659 = vmatpush.bf16.msra.mxu2 %v1070_v7 }
  0x66   : > { %1139 = vmatpush.bf16.msrb.mxu3 %v1064_v11 }
  0x6a   : > { %1140 = vmatpush.bf16.msrb.mxu3 %v1063_v13 }
  0x6e   : > { %1141 = vmatpush.bf16.msrb.mxu3 %v1062_v19 }
  0x71   : > { %496 = vmatmul.bf16.gmra.mxu0 %v890_v40  ;;  %565 = vmatmul.bf16.vlgmr.msrb.gmra.mxu3 %v926_v41 }
  0x72   : > { %545 = vmatmul.bf16.gmra.mxu1 %v894_v42  ;;  %1142 = vmatpush.bf16.msra.mxu3 %v1077_v52 }
  0x76   : > { %1143 = vmatpush.bf16.msra.mxu3 %v1076_v53 }
  0x7a   : > { %1144 = vmatpush.bf16.msra.mxu3 %v1075_v54 }
  0x7e   : > { %1145 = vmatpush.bf16.msra.mxu3 %v1074_v59 }
  0x81   : > { %501 = vmatmul.bf16.gmra.mxu0 %v898_v49  ;;  %570 = vmatmul.bf16.gmra.mxu3 %v934_v50 }
  0x82   : > { %550 = vmatmul.bf16.gmra.mxu1 %v902_v51  ;;  %1146 = vmatpush.bf16.msra.mxu3 %v1073_v62 }
  0x86   : > { %1147 = vmatpush.bf16.msra.mxu3 %v1072_v5 }
  0x8a   : > { %1148 = vmatpush.bf16.msra.mxu3 %v1071_v6 }
  0x8e   : > { %1149 = vmatpush.bf16.msra.mxu3 %v1070_v7 }
  0x91   : > { %506 = vmatmul.bf16.gmra.mxu0 %v906_v60 }
  0x92   : > { %555 = vmatmul.bf16.gmra.mxu1 %v910_v61 }
  0xa1   : > { %511 = vmatmul.bf16.gmra.mxu0 %v914_v3 }
  0xa2   : > { %560 = vmatmul.bf16.gmra.mxu1 %v918_v4 }
  0xce   : > { %v487_v8 = vpop.f32.mrf.mxu0 }
  0xcf   : > { %v536_v9 = vpop.f32.mrf.mxu1 }
  0xd0   : > { %v537_v13 = vadd.f32 %v536_v9, %v487_v8 }
  0xd4   : > { %v517_v10 = vpop.f32.mrf.mxu3 }
  0xd6   : > { %v489_v11 = vpop.f32.mrf.mxu0 }
  0xd7   : > { %v538_v12 = vpop.f32.mrf.mxu1 }
  0xd8   : > { %v539_v14 = vadd.f32 %v538_v12, %v489_v11 }
  0xda   : > { %v576_v15 = vpack.c.bf16 %v539_v14, %v537_v13 }
  0xdc   : > { %660 = vmatmul.bf16.vlgmr.msra.gmra.mxu2 %v576_v15  ;;  %v519_v16 = vpop.f32.mrf.mxu3 }
  0xde   : > { %v492_v17 = vpop.f32.mrf.mxu0 }
  0xdf   : > { %v541_v18 = vpop.f32.mrf.mxu1 }
  0xe0   : > { %v542_v22 = vadd.f32 %v541_v18, %v492_v17 }
  0xe4   : > { %v522_v19 = vpop.f32.mrf.mxu3 }
  0xe6   : > { %v494_v20 = vpop.f32.mrf.mxu0 }
  0xe7   : > { %v543_v21 = vpop.f32.mrf.mxu1 }
  0xe8   : > { %v544_v23 = vadd.f32 %v543_v21, %v494_v20 }
  0xea   : > { %v577_v24 = vpack.c.bf16 %v544_v23, %v542_v22 }
  0xec   : > { %665 = vmatmul.bf16.gmra.mxu2 %v577_v24  ;;  %v524_v25 = vpop.f32.mrf.mxu3 }
  0xee   : > { %v497_v26 = vpop.f32.mrf.mxu0 }
  0xef   : > { %v546_v27 = vpop.f32.mrf.mxu1 }
  0xf0   : > { %v547_v31 = vadd.f32 %v546_v27, %v497_v26 }
  0xf4   : > { %v566_v28 = vpop.f32.mrf.mxu3 }
  0xf5   : > { %v567_v35 = vadd.f32 %v566_v28, %v517_v10 }
  0xf6   : > { %v499_v29 = vpop.f32.mrf.mxu0 }
  0xf7   : > { %v548_v30 = vpop.f32.mrf.mxu1 }
  0xf8   : > { %v549_v32 = vadd.f32 %v548_v30, %v499_v29 }
  0xfa   : > { %v578_v33 = vpack.c.bf16 %v549_v32, %v547_v31 }
  0xfc   : > { %670 = vmatmul.bf16.gmra.mxu2 %v578_v33  ;;  %v568_v34 = vpop.f32.mrf.mxu3 }
  0xfd   : > { %v569_v36 = vadd.f32 %v568_v34, %v519_v16 }
  0xfe   : > { %v502_v37 = vpop.f32.mrf.mxu0 }
  0xff   : > { %v582_v38 = vpack.c.bf16 %v569_v36, %v567_v35  ;;  %v551_v39 = vpop.f32.mrf.mxu1 }
 0x100   : > { %v552_v43 = vadd.f32 %v551_v39, %v502_v37 }
 0x101   : > { %690 = vmatmul.bf16.vlgmr.msra.gmra.mxu3 %v582_v38 }
 0x104   : > { %v571_v40 = vpop.f32.mrf.mxu3 }
 0x105   : > { %v572_v47 = vadd.f32 %v571_v40, %v522_v19 }
 0x106   : > { %v504_v41 = vpop.f32.mrf.mxu0 }
 0x107   : > { %v553_v42 = vpop.f32.mrf.mxu1 }
 0x108   : > { %v554_v44 = vadd.f32 %v553_v42, %v504_v41 }
 0x10a   : > { %v579_v45 = vpack.c.bf16 %v554_v44, %v552_v43 }
 0x10c   : > { %675 = vmatmul.bf16.gmra.mxu2 %v579_v45  ;;  %v573_v46 = vpop.f32.mrf.mxu3 }
 0x10d   : > { %v574_v48 = vadd.f32 %v573_v46, %v524_v25 }
 0x10e   : > { %v507_v49 = vpop.f32.mrf.mxu0 }
 0x10f   : > { %v556_v50 = vpop.f32.mrf.mxu1  ;;  %v583_v51 = vpack.c.bf16 %v574_v48, %v572_v47 }
 0x110   : > { %v557_v54 = vadd.f32 %v556_v50, %v507_v49 }
 0x111   : > { %695 = vmatmul.bf16.gmra.mxu3 %v583_v51 }
 0x116   : > { %v509_v52 = vpop.f32.mrf.mxu0 }
 0x117   : > { %v558_v53 = vpop.f32.mrf.mxu1 }
 0x118   : > { %v559_v55 = vadd.f32 %v558_v53, %v509_v52 }
 0x11a   : > { %v580_v56 = vpack.c.bf16 %v559_v55, %v557_v54 }
 0x11c   : > { %680 = vmatmul.bf16.gmra.mxu2 %v580_v56 }
 0x11e   : > { %v512_v57 = vpop.f32.mrf.mxu0 }
 0x11f   : > { %v561_v58 = vpop.f32.mrf.mxu1 }
 0x120   : > { %v562_v61 = vadd.f32 %v561_v58, %v512_v57 }
 0x126   : > { %v514_v59 = vpop.f32.mrf.mxu0 }
 0x127   : > { %v563_v60 = vpop.f32.mrf.mxu1 }
 0x128   : > { %v564_v62 = vadd.f32 %v563_v60, %v514_v59 }
 0x12a   : > { %v581_v63 = vpack.c.bf16 %v564_v62, %v562_v61 }
 0x12c   : > { %685 = vmatmul.bf16.gmra.mxu2 %v581_v63 }
 0x15f   : > { %v661_v0 = vpop.f32.mrf.mxu2 }
 0x160   : > { %v662_v2 = vadd.f32 %v1564_v1, %v661_v0 }
 0x162   : > { %v701_v5 = vmax.f32 %v662_v2, 0.0 }
 0x167   : > { %v663_v3 = vpop.f32.mrf.mxu2 }
 0x168   : > { %v664_v4 = vadd.f32 %v1564_v1, %v663_v3 }
 0x16a   : > { %v702_v6 = vmax.f32 %v664_v4, 0.0 }
 0x16c   : > { %v1082_v7 = vpack.c.bf16 %v702_v6, %v701_v5 }
 0x16e   : > { %1083 = vst [vmem:[%s1569_s5] sm:$0xff] %v1082_v7  }
 0x16f   : > { %v666_v8 = vpop.f32.mrf.mxu2 }
 0x170   : > { %v667_v9 = vadd.f32 %v1564_v1, %v666_v8 }
 0x172   : > { %v703_v12 = vmax.f32 %v667_v9, 0.0 }
 0x177   : > { %v668_v10 = vpop.f32.mrf.mxu2 }
 0x178   : > { %v669_v11 = vadd.f32 %v1564_v1, %v668_v10 }
 0x17a   : > { %v704_v13 = vmax.f32 %v669_v11, 0.0 }
 0x17c   : > { %v1087_v14 = vpack.c.bf16 %v704_v13, %v703_v12 }
 0x17e   : > { %1119 = vst [vmem:[%s1569_s5 + $0x8] sm:$0xff] %v1087_v14  }
 0x17f   : > { %v671_v15 = vpop.f32.mrf.mxu2 }
 0x180   : > { %v672_v17 = vadd.f32 %v1564_v1, %v671_v15 }
 0x182   : > { %v705_v20 = vmax.f32 %v672_v17, 0.0 }
 0x184   : > { %v691_v16 = vpop.f32.mrf.mxu3 }
 0x185   : > { %v692_v22 = vadd.f32 %v1564_v1, %v691_v16 }
 0x187   : > { %v673_v18 = vpop.f32.mrf.mxu2  ;;  %v713_v26 = vmax.f32 %v692_v22, 0.0 }
 0x188   : > { %v674_v19 = vadd.f32 %v1564_v1, %v673_v18 }
 0x18a   : > { %v706_v21 = vmax.f32 %v674_v19, 0.0 }
 0x18c   : > { %v1092_v23 = vpack.c.bf16 %v706_v21, %v705_v20  ;;  %v693_v24 = vpop.f32.mrf.mxu3 }
 0x18d   : > { %v694_v25 = vadd.f32 %v1564_v1, %v693_v24 }
 0x18e   : > { %1120 = vst [vmem:[%s1569_s5 + $0x10] sm:$0xff] %v1092_v23  }
 0x18f   : > { %v714_v27 = vmax.f32 %v694_v25, 0.0  ;;  %v676_v28 = vpop.f32.mrf.mxu2 }
 0x190   : > { %v677_v31 = vadd.f32 %v1564_v1, %v676_v28 }
 0x191   : > { %v1112_v29 = vpack.c.bf16 %v714_v27, %v713_v26 }
 0x192   : > { %v707_v34 = vmax.f32 %v677_v31, 0.0 }
 0x193   : > { %1124 = vst [vmem:[%s1569_s5 + $0x30] sm:$0xff] %v1112_v29  }
 0x194   : > { %v696_v30 = vpop.f32.mrf.mxu3 }
 0x195   : > { %v697_v36 = vadd.f32 %v1564_v1, %v696_v30 }
 0x197   : > { %v678_v32 = vpop.f32.mrf.mxu2  ;;  %v715_v40 = vmax.f32 %v697_v36, 0.0 }
 0x198   : > { %v679_v33 = vadd.f32 %v1564_v1, %v678_v32 }
 0x19a   : > { %v708_v35 = vmax.f32 %v679_v33, 0.0 }
 0x19c   : > { %v1097_v37 = vpack.c.bf16 %v708_v35, %v707_v34  ;;  %v698_v38 = vpop.f32.mrf.mxu3 }
 0x19d   : > { %v699_v39 = vadd.f32 %v1564_v1, %v698_v38 }
 0x19e   : > { %1121 = vst [vmem:[%s1569_s5 + $0x18] sm:$0xff] %v1097_v37  }
 0x19f   : > { %v716_v41 = vmax.f32 %v699_v39, 0.0  ;;  %v681_v42 = vpop.f32.mrf.mxu2 }
 0x1a0   : > { %v682_v44 = vadd.f32 %v1564_v1, %v681_v42 }
 0x1a1   : > { %v1117_v43 = vpack.c.bf16 %v716_v41, %v715_v40 }
 0x1a2   : > { %v709_v47 = vmax.f32 %v682_v44, 0.0 }
 0x1a3   : > { %1125 = vst [vmem:[%s1569_s5 + $0x38] sm:$0xff] %v1117_v43  }
 0x1a7   : > { %v683_v45 = vpop.f32.mrf.mxu2 }
 0x1a8   : > { %v684_v46 = vadd.f32 %v1564_v1, %v683_v45 }
 0x1aa   : > { %v710_v48 = vmax.f32 %v684_v46, 0.0 }
 0x1ac   : > { %v1102_v49 = vpack.c.bf16 %v710_v48, %v709_v47 }
 0x1ae   : > { %1122 = vst [vmem:[%s1569_s5 + $0x20] sm:$0xff] %v1102_v49  }
 0x1af   : > { %v686_v50 = vpop.f32.mrf.mxu2 }
 0x1b0   : > { %v687_v51 = vadd.f32 %v1564_v1, %v686_v50 }
 0x1b2   : > { %v711_v54 = vmax.f32 %v687_v51, 0.0 }
 0x1b7   : > { %v688_v52 = vpop.f32.mrf.mxu2 }
 0x1b8   : > { %v689_v53 = vadd.f32 %v1564_v1, %v688_v52 }
 0x1ba   : > { %v712_v55 = vmax.f32 %v689_v53, 0.0 }
 0x1bc   : > { %v1107_v56 = vpack.c.bf16 %v712_v55, %v711_v54 }
 0x1be   : > { %1123 = vst [vmem:[%s1569_s5 + $0x28] sm:$0xff] %v1107_v56  }
 0x1bf   : > { %1341 = shalt.err (!%p1338_p10)
}
 0x1c0   : > { %s1392_s28 = smov 64   ;;  %s1393_s26 = smov 4  }
 0x1c1   : > { %1160 = dma.vmem_to_hbm [thread:$0]  (%p1485_p3), %s763_s23, 1024, %s765_s24, %s750_s25, %s1392_s28, %s1392_s28, %s1393_s26  }
 0x1c2 PF: > { %s779_s30 = sand.u32 1, %s1372_s15   ;;  %p1637_p12 = scmp.ge.s32.totalorder %s1384_s18, 2 }
 0x1c3   : > { %s780_s5 = scalar_lea.sflag [#allocation4], %s779_s30 }
 0x1c4   : > { %p1174_p13 = pnand %p1637_p12, %p1454_p6 }
 0x1c6   : > { %p1175_p0 = pneg %p1174_p13 }
 0x1c8   : > { %1367 = dma.done.wait (%p1175_p0), %s780_s5, 1024  }
 0x1c9   : > { %1369 = vsyncadd (%p1175_p0), %s780_s5, 4294966272  ;;  %p18_p5 = scmp.ge.s32.totalorder %s1475_s10, 4   ;;  %s1638_s15 = smov %s1376_s16 }
 0x1ca   : > { %s1639_s16 = smov %s1380_s17  ;;  %s1640_s17 = smov %s1491_s14 }
 0x1cb   : > { %s1641_s18 = smov %s1475_s10  ;;  %20 = sbr.rel (!%p18_p5) target bundleno = 6 (0x6), region = 89 }
 0x1d0   :  { %786 = vsyncpa [#allocation3], 1 }
 0x1d1   :  { %788 = vsyncpa [#allocation3 + $0x1], 1 }
 0x1d2   :  { %789 = vsyncpa [#allocation6], 1 }
 0x1d3   :  { %790 = vsyncpa [#allocation4], 1 }
 0x1d4   :  { %792 = vsyncpa [#allocation4 + $0x1], 1 }

</bundles_post_ra>
